<compile_context>
chip_gen: v7x
topology: tpu7x:2x2x1
jax: 0.10.0
libtpu: 0.0.40
codegen_flags: <defaults>
</compile_context>

<pallas_src>
import jax
import jax.numpy as jnp
from jax.experimental import pallas as pl
from jax.experimental.pallas import tpu as pltpu


_LANE = 128
_MIB = 1024 * 1024


def _select_budget():
    """Generation-aware (max per-tensor block bytes, scoped VMEM limit)."""
    vmem_cap = None
    try:
        info = pltpu.get_tpu_info()
        vmem_cap = getattr(info, "vmem_capacity_bytes", None)
    except Exception:
        vmem_cap = None
    if vmem_cap is not None and vmem_cap > 64 * _MIB:
        # v5e / v6e: 128 MiB physical VMEM.
        # 3 tensors x (in+out) x 2 pipeline buffers x 4 MiB = 48 MiB < 64 MiB.
        return 4 * _MIB, 64 * _MIB
    # v7x (64 MiB per TC) or unknown backend: stay conservative.
    # 3 tensors x (in+out) x 2 buffers x 2 MiB = 24 MiB < 32 MiB.
    return 2 * _MIB, 32 * _MIB


def _fused_identity_copy(arrays):
    """Copy several (B, C_t, N) tensors (shared B, N) via ONE pallas_call."""
    n = len(arrays)
    B = arrays[0].shape[0]
    N = arrays[0].shape[-1]

    max_block_bytes, vmem_limit = _select_budget()

    # Shared N tile: a multiple of 128 (or all of N) such that the widest
    # tensor's (1, C, tile_n) block fits the per-tensor byte budget.  A partial
    # final block (N not a multiple of tile_n) is clipped by Pallas itself —
    # fine for a pure copy (masked output writes, no compute on the pad rows).
    if N <= _LANE:
        tile_n = N
    else:
        worst_bytes_per_col = max(a.shape[1] * a.dtype.itemsize for a in arrays)
        tile_n = (max_block_bytes // max(worst_bytes_per_col, 1)) // _LANE * _LANE
        tile_n = int(max(_LANE, min(tile_n, N)))

    grid = (B, pl.cdiv(N, tile_n))

    def idx_map(b, j):
        return (b, 0, j)

    # Block shape per tensor: (1, full C_t, tile_n).  Second-last dim equals
    # the full array dim (allowed exception to the (8,128) rule for any dtype
    # packing); last dim is 128-aligned or the full N.
    in_specs = [pl.BlockSpec((1, a.shape[1], tile_n), idx_map) for a in arrays]
    out_specs = [pl.BlockSpec((1, a.shape[1], tile_n), idx_map) for a in arrays]
    out_shape = tuple(jax.ShapeDtypeStruct(a.shape, a.dtype) for a in arrays)

    def kernel(*refs):
        # refs = (*input_refs, *output_refs); pure VMEM pass-through.
        for x_ref, o_ref in zip(refs[:n], refs[n:]):
            o_ref[...] = x_ref[...]

    outs = pl.pallas_call(
        kernel,
        out_shape=out_shape,
        grid_spec=pltpu.PrefetchScalarGridSpec(
            num_scalar_prefetch=0,
            grid=grid,
            in_specs=in_specs,
            out_specs=out_specs,
        ),
        compiler_params=pltpu.CompilerParams(
            # Uniform tile counts for every tensor -> no output block is ever
            # revisited, so both axes stay 'parallel' (v7x megacore sharding).
            dimension_semantics=("parallel", "parallel"),
            vmem_limit_bytes=vmem_limit,
        ),
    )(*arrays)

    if not isinstance(outs, (tuple, list)):
        outs = (outs,)
    return tuple(outs)


def _materialize(arrays):
    """Fresh copies of `arrays`, fused into one launch when shapes allow."""
    if (all(a.ndim == 3 for a in arrays)
            and len({(a.shape[0], a.shape[-1]) for a in arrays}) == 1):
        return list(_fused_identity_copy(arrays))
    # TODO(synk): tensors not sharing (B, N) fall back to plain XLA copies —
    # a bare HBM->HBM copy is already at the roofline without Pallas.
    return [jnp.array(a, copy=True) for a in arrays]


def identity_forward(input, points, support_points=None, indices=None,
                     *, materialize=False):
    """Pallas equivalent of Identity.forward: returns (input, support_points, indices).

    Default (materialize=False): exact PyTorch nn.Identity semantics — the same
    arrays are returned (pure aliasing, no HBM traffic, no kernel launch).
    `points` is accepted for API compatibility but, as in PyTorch, not returned.

    materialize=True: returns freshly materialized copies produced by a single
    fused, lane-dense Pallas copy kernel (one launch for all tensors).
    """
    if not materialize:
        return (input, support_points, indices)

    to_copy = [input]
    if support_points is not None:
        to_copy.append(support_points)
    if indices is not None:
        to_copy.append(indices)

    copies = _materialize(to_copy)
    out_input = copies.pop(0)
    out_support = copies.pop(0) if support_points is not None else None
    out_indices = copies.pop(0) if indices is not None else None
    return (out_input, out_support, out_indices)


if __name__ == "__main__":
    key = jax.random.PRNGKey(0)
    k1, k2, k3, k4 = jax.random.split(key, 4)

    B, I, D, N, K = 2, 4, 3, 16, 8

    input_feats = jax.random.normal(k1, (B, I, N), dtype=jnp.float32)
    points = jax.random.normal(k2, (B, D, N), dtype=jnp.float32)
    support_points = jax.random.normal(k3, (B, D, N), dtype=jnp.float32)
    indices = jax.random.randint(k4, (B, K, N), 0, N, dtype=jnp.int32)

    # ---- Default fast path: pure aliasing, identical to PyTorch Identity. ----
    o_in, o_sup, o_idx = identity_forward(input_feats, points, support_points, indices)
    assert o_in is input_feats
    assert o_sup is support_points
    assert o_idx is indices

    # ---- Materialized path: single fused Pallas copy kernel. ----
    m_in, m_sup, m_idx = identity_forward(
        input_feats, points, support_points, indices, materialize=True
    )
    jax.block_until_ready((m_in, m_sup, m_idx))

    assert m_in.shape == input_feats.shape and m_in.dtype == input_feats.dtype
    assert m_sup.shape == support_points.shape and m_sup.dtype == support_points.dtype
    assert m_idx.shape == indices.shape and m_idx.dtype == indices.dtype
    assert bool(jnp.all(m_in == input_feats))
    assert bool(jnp.all(m_sup == support_points))
    assert bool(jnp.all(m_idx == indices))

    # ---- None pass-through (PyTorch default-arg behavior). ----
    a, b, c = identity_forward(input_feats, points)
    assert a is input_feats and b is None and c is None

    a2, b2, c2 = identity_forward(input_feats, points, materialize=True)
    jax.block_until_ready(a2)
    assert b2 is None and c2 is None
    assert bool(jnp.all(a2 == input_feats))

    print("KERNEL_OK")
</pallas_src>

<mosaic_0001>
module attributes {stable_mosaic.version = 11 : i64} {
  func.func @kernel(%arg0: i32, %arg1: i32, %arg2: memref<1x4x16xf32, #tpu.memory_space<vmem>>, %arg3: memref<1x3x16xf32, #tpu.memory_space<vmem>>, %arg4: memref<1x8x16xi32, #tpu.memory_space<vmem>>, %arg5: memref<1x4x16xf32, #tpu.memory_space<vmem>>, %arg6: memref<1x3x16xf32, #tpu.memory_space<vmem>>, %arg7: memref<1x8x16xi32, #tpu.memory_space<vmem>>) attributes {dimension_semantics = [#tpu.dimension_semantics<parallel>, #tpu.dimension_semantics<parallel>], iteration_bounds = array<i64: 2, 1>, scalar_prefetch = 0 : i64, scratch_operands = 0 : i64, tpu.core_type = #tpu.core_type<tc>, window_params = [{transform_indices = @transform_0, window_bounds = array<i64: 1, 4, 16>}, {transform_indices = @transform_1, window_bounds = array<i64: 1, 3, 16>}, {transform_indices = @transform_2, window_bounds = array<i64: 1, 8, 16>}, {transform_indices = @transform_3, window_bounds = array<i64: 1, 4, 16>}, {transform_indices = @transform_4, window_bounds = array<i64: 1, 3, 16>}, {transform_indices = @transform_5, window_bounds = array<i64: 1, 8, 16>}]} {
    %c0 = arith.constant 0 : index
    %c0_0 = arith.constant 0 : index
    %c0_1 = arith.constant 0 : index
    %0 = vector.load %arg2[%c0, %c0_0, %c0_1] : memref<1x4x16xf32, #tpu.memory_space<vmem>>, vector<1x4x16xf32>
    %c0_2 = arith.constant 0 : index
    %c0_3 = arith.constant 0 : index
    %c0_4 = arith.constant 0 : index
    %1 = vector.load %arg5[%c0_2, %c0_3, %c0_4] : memref<1x4x16xf32, #tpu.memory_space<vmem>>, vector<1x4x16xf32>
    tpu.vector_store %arg5[%c0_2, %c0_3, %c0_4], %0 {strides = array<i32>} : memref<1x4x16xf32, #tpu.memory_space<vmem>>, vector<1x4x16xf32>,
    %c0_5 = arith.constant 0 : index
    %c0_6 = arith.constant 0 : index
    %c0_7 = arith.constant 0 : index
    %2 = vector.load %arg3[%c0_5, %c0_6, %c0_7] : memref<1x3x16xf32, #tpu.memory_space<vmem>>, vector<1x3x16xf32>
    %c0_8 = arith.constant 0 : index
    %c0_9 = arith.constant 0 : index
    %c0_10 = arith.constant 0 : index
    %3 = vector.load %arg6[%c0_8, %c0_9, %c0_10] : memref<1x3x16xf32, #tpu.memory_space<vmem>>, vector<1x3x16xf32>
    tpu.vector_store %arg6[%c0_8, %c0_9, %c0_10], %2 {strides = array<i32>} : memref<1x3x16xf32, #tpu.memory_space<vmem>>, vector<1x3x16xf32>,
    %c0_11 = arith.constant 0 : index
    %c0_12 = arith.constant 0 : index
    %c0_13 = arith.constant 0 : index
    %4 = vector.load %arg4[%c0_11, %c0_12, %c0_13] : memref<1x8x16xi32, #tpu.memory_space<vmem>>, vector<1x8x16xi32>
    %c0_14 = arith.constant 0 : index
    %c0_15 = arith.constant 0 : index
    %c0_16 = arith.constant 0 : index
    %5 = vector.load %arg7[%c0_14, %c0_15, %c0_16] : memref<1x8x16xi32, #tpu.memory_space<vmem>>, vector<1x8x16xi32>
    tpu.vector_store %arg7[%c0_14, %c0_15, %c0_16], %4 {strides = array<i32>} : memref<1x8x16xi32, #tpu.memory_space<vmem>>, vector<1x8x16xi32>,
    return
  }
  func.func @transform_0(%arg0: i32, %arg1: i32) -> (i32, i32, i32) {
    %c0_i32 = arith.constant 0 : i32
    %c0_i32_0 = arith.constant 0 : i32
    return %arg0, %c0_i32, %arg1 : i32, i32, i32
  }
  func.func @transform_1(%arg0: i32, %arg1: i32) -> (i32, i32, i32) {
    %c0_i32 = arith.constant 0 : i32
    %c0_i32_0 = arith.constant 0 : i32
    return %arg0, %c0_i32, %arg1 : i32, i32, i32
  }
  func.func @transform_2(%arg0: i32, %arg1: i32) -> (i32, i32, i32) {
    %c0_i32 = arith.constant 0 : i32
    %c0_i32_0 = arith.constant 0 : i32
    return %arg0, %c0_i32, %arg1 : i32, i32, i32
  }
  func.func @transform_3(%arg0: i32, %arg1: i32) -> (i32, i32, i32) {
    %c0_i32 = arith.constant 0 : i32
    %c0_i32_0 = arith.constant 0 : i32
    return %arg0, %c0_i32, %arg1 : i32, i32, i32
  }
  func.func @transform_4(%arg0: i32, %arg1: i32) -> (i32, i32, i32) {
    %c0_i32 = arith.constant 0 : i32
    %c0_i32_0 = arith.constant 0 : i32
    return %arg0, %c0_i32, %arg1 : i32, i32, i32
  }
  func.func @transform_5(%arg0: i32, %arg1: i32) -> (i32, i32, i32) {
    %c0_i32 = arith.constant 0 : i32
    %c0_i32_0 = arith.constant 0 : i32
    return %arg0, %c0_i32, %arg1 : i32, i32, i32
  }
}

</mosaic_0001>

<bundles_post_ra>
// kernel: tpu_custom_call.1
= control target key start
LH: loop header
LB: loop body
LE: loop exit
PB: predicated region body
PF: predicated region fallthrough
CT: control target
= control target key end

     0   :  { %s1043_s0 = inlined_call_operand.hbm [shape: f32[2,4,16], index: 0, kind: input, shape index: {}]   ;;  %s1044_s1 = inlined_call_operand.vmem [shape: f32[2,3,16], index: 1, kind: input, shape index: {}]   ;;  %s1045_s2 = inlined_call_operand.vmem [shape: s32[2,8,16], index: 2, kind: input, shape index: {}]   ;;  %s1046_s3 = inlined_call_operand.hbm [shape: f32[2,4,16], index: 3, kind: output, shape index: {0}]   ;;  %s1047_s4 = inlined_call_operand.vmem [shape: f32[2,3,16], index: 4, kind: output, shape index: {1}]   ;;  %s1048_s5 = inlined_call_operand.hbm [shape: s32[2,8,16], index: 5, kind: output, shape index: {2}]  }
   0x1   :  { %1053 = sst [smem:[#allocation15_spill]] %s1043_s0 }
   0x2   :  { %11 = vsyncpa [#allocation3], 0 }
   0x3   :  { %13 = vsyncpa [#allocation3 + $0x1], 0 }
   0x4   :  { %14 = vsyncpa [#allocation4], 0 }
   0x5   :  { %16 = vsyncpa [#allocation4 + $0x1], 0 }
   0x6   :  { %17 = vsyncpa [#allocation7], 0 }
   0x7   :  { %19 = vsyncpa [#allocation7 + $0x1], 0  ;;  %s836_s18 = smov 0   ;;  %s838_s19 = smov 0  }
   0x8   :  { %s840_s20 = smov 0   ;;  %s842_s21 = smov 0  }
   0x9   :  { %s844_s22 = smov 0   ;;  %s846_s23 = smov 0  }
   0xa LB: > { %1054 = sst [smem:[#allocation11_spill]] %s789_s20  ;;  %s571_s24 = sadd.s32 4294967295, %s801_s23   ;;  %s801_s23 = sphi %s846_s23, %s25_s23   ;;  %s797_s22 = sphi %s844_s22, %s1072_s22   ;;  %s793_s21 = sphi %s842_s21, %s1071_s21   ;;  %s789_s20 = sphi %s840_s20, %s1070_s20   ;;  %s785_s19 = sphi %s838_s19, %s1074_s19   ;;  %s781_s18 = sphi %s836_s18, %s1073_s18  }
   0xb   : > { %1055 = sst [smem:[#allocation12_spill]] %s797_s22  ;;  %s572_s25 = sadd.s32 4294967294, %s801_s23  }
   0xc   : > { %s37_s26 = sadd.s32 1, %s797_s22  ;;  %s46_s27 = sadd.s32 1, %s789_s20 }
   0xd   : > { %p39_p0 = scmp.ge.s32.totalorder %s37_s26, 2  ;;  %p53_p1 = scmp.ne.s32.totalorder %s789_s20, %s785_s19 }
   0xe   : > { %p54_p2 = scmp.eq.s32.totalorder %s801_s23, 0  ;;  %p59_p3 = scmp.ne.s32.totalorder %s785_s19, %s781_s18 }
   0xf   : > { %s1076_s26 = smov (%p39_p0, %s37_s26), 0  ;;  %p60_p5 = scmp.eq.s32.totalorder %s571_s24, 0 }
  0x10   : > { %1056 = sst [smem:[#allocation13_spill]] %s1076_s26  ;;  %p877_p4 = por %p54_p2, %p53_p1 }
  0x11   : > { %s41_s29 = ssub.s32 %s797_s22, %s1076_s26  ;;  %p141_p6 = scmp.eq.s32.totalorder %s571_s24, 1 }
  0x12   : > { %p44_p7 = scmp.eq.s32.totalorder %s41_s29, 0  ;;  %p883_p8 = por %p60_p5, %p59_p3 }
  0x13   : > { %p887_p9 = por %p141_p6, %p53_p1  ;;  %p147_p10 = scmp.eq.s32.totalorder %s572_s25, 1 }
  0x14   : > { %s892_s7 = scalar_select %p44_p7, %s789_s20, %s46_s27  }
  0x15   : > { %s1059_s6 = scalar_select %p887_p9, 1, 0 }
  0x16   : > { %1060 = sst [smem:[#allocation14_spill]] %s892_s7  ;;  %p894_p11 = por %p147_p10, %p59_p3 }
  0x17   : > { %p607_p13 = scmp.lt.s32.totalorder %s801_s23, 2  ;;  %s223_s9 = sand.u32 1, %s789_s20  }
  0x18   : > { %s1061_s8 = scalar_select %p894_p11, 1, 0 }
  0x19   : > { %s575_s10 = sshll.u32 %s223_s9, 2  ;;  %s576_s11 = sshll.u32 %s797_s22, 6 }
  0x1a   : > { %s1062_s0 = sld [smem:[#allocation15_spill]]  ;;  %s227_s15 = scalar_lea.vmem [#allocation2], %s575_s10 }
  0x1b   : > { %s235_s16 = sshll.u32 %s227_s15, 4  ;;  %p911_p0 = pnand %p607_p13, %p877_p4  ;;  %s907_s16 = int_to_ptr.vmem [resolvable:$true] %s235_s16 }
  0x1c   : > { %s224_s24 = scalar_lea.sflag [#allocation3], %s223_s9 }
  0x1d   : > { %p659_p5 = pneg %p911_p0 }
  0x20   : > { %s905_s14 = scalar_lea.hbm %s1062_s0, %s576_s11  ;;  %s662_s28 = scalar_lea.hbm %s1062_s0, 128 }
  0x21   : > { %s657_s25 = scalar_lea.hbm %s905_s14, 64  ;;  %p663_p4 = scmp.lt.u32.totalorder %s905_s14, %s1062_s0 }
  0x22   : > { %p658_p3 = scmp.ne.s32.totalorder %s905_s14, %s657_s25  ;;  %p664_p10 = scmp.lt.u32.totalorder %s662_s28, %s657_s25 }
  0x23   : > { %p666_p12 = scmp.lt.u32.totalorder %s657_s25, %s905_s14 }
  0x24   : > { %p660_p6 = pnand %p659_p5, %p658_p3  ;;  %p665_p13 = por %p664_p10, %p663_p4 }
  0x26   : > { %p661_p7 = pneg %p660_p6  ;;  %p667_p1 = por %p666_p12, %p665_p13 }
  0x28   : > { %p668_p2 = pnand %p667_p1, %p661_p7 }
  0x2a   : > { %671 = shalt.err (!%p668_p2)
}
  0x2b   : > { %s672_s9 = scalar_lea.vmem %s907_s16, 64  ;;  %s803_s12 = smov [#allocation2]  }
  0x2c   : > { %p673_p3 = scmp.ne.s32.totalorder %s907_s16, %s672_s9  ;;  %s677_s13 = sshll.u32 %s803_s12, 4  ;;  %s678_s13 = int_to_ptr.vmem [resolvable:$false] %s677_s13 }
  0x2d   : > { %s679_s15 = scalar_lea.vmem %s678_s13, 128  ;;  %p680_p9 = scmp.lt.s32.totalorder %s907_s16, %s678_s13 }
  0x2e   : > { %p675_p6 = pnand %p673_p3, %p659_p5  ;;  %p681_p4 = scmp.lt.s32.totalorder %s679_s15, %s672_s9 }
  0x30   : > { %p676_p11 = pneg %p675_p6  ;;  %p682_p10 = por %p681_p4, %p680_p9 }
  0x32   : > { %p683_p12 = pnand %p682_p10, %p676_p11 }
  0x34   : > { %686 = shalt.err (!%p683_p12)
}
  0x35   : > { %599 = dma.hbm_to_vmem [thread:$0]  (!%p911_p0), %s905_s14, 64, %s907_s16, %s224_s24  }
  0x36   : > { %p1064_p1 = scmp.lt.s32.totalorder %s801_s23, 3  ;;  %p1065_p2 = scmp.ge.s32.totalorder %s801_s23, 1 }
  0x38   : > { %p261_p5 = pnand %p1065_p2, %p1064_p1 }
  0x39   : > { %s947_s25 = sand.u32 (!%p261_p5), 1, %s785_s19  }
  0x3a   : > { %264 = sbr.rel (%p261_p5) target bundleno = 121 (0x79), region = 32  ;;  %s578_s27 = sshll.u32 (!%p261_p5), %s947_s25, 2 }
  0x3b   : > { %s267_s29 = scalar_lea.sflag (!%p261_p5), [#allocation3], %s947_s25  ;;  %s270_s28 = scalar_lea.vmem (!%p261_p5), [#allocation2], %s578_s27 }
  0x41   : > { %768 = dma.done.wait (%p883_p8), %s267_s29, 64  }
  0x42   : > { %770 = vsyncadd (%p883_p8), %s267_s29, 4294967232  ;;  %s580_s14 = sshll.u32 %s947_s25, 3  ;;  %s306_s16 = scalar_lea.vmem [#allocation5], %s578_s27  ;;  %vm345_vm0 = vcmask 125952   ;;  %vm351_vm1 = vcmask 130048   ;;  %vm348_vm2 = vcmask 124928  }
  0x43   : > { %s380_s17 = sshll.u32 %s306_s16, 4  ;;  %p323_p9 = scmp.lt.s32.totalorder %s793_s21, 1  ;;  %v344_v0 = vld [vmem:[%s270_s28] sm:$0xf]  ;;  %s956_s17 = int_to_ptr.vmem [resolvable:$true] %s380_s17 }
  0x44   : > { %s322_s24 = scalar_lea.vmem [#allocation6], %s580_s14  ;;  %s586_s9 = sshll.u32 %s793_s21, 6  ;;  %346 = vst.msk [vmem:[%s306_s16] sm:$0xf] %vm345_vm0, %v344_v0 }
  0x45   : > { %s397_s10 = sshll.u32 %s322_s24, 4  ;;  %s975_s28 = scalar_lea.hbm %s1046_s3, %s586_s9  ;;  %s960_s10 = int_to_ptr.vmem [resolvable:$true] %s397_s10 }
  0x46   : > { %s324_s11 = scalar_select %p323_p9, %s793_s21, 1 }
  0x47   : > { %s687_s13 = scalar_lea.vmem %s956_s17, 64  ;;  %p1066_p11 = scmp.ne.s32.totalorder %s1059_s6, 0 }
  0x48   : > { %s582_s30 = sshll.u32 %s324_s11, 3  ;;  %s581_s12 = sshll.u32 %s324_s11, 2 }
  0x49   : > { %s336_s27 = scalar_lea.vmem %s1045_s2, %s582_s30  ;;  %s329_s0 = scalar_lea.vmem %s1044_s1, %s581_s12 }
  0x4a   : > { %v350_v1 = vld [vmem:[%s336_s27] sm:$0xff]  ;;  %s343_s7 = scalar_lea.vmem %s1047_s4, %s581_s12  ;;  %s354_s30 = scalar_lea.sflag [#allocation4], %s947_s25 }
  0x4b   : > { %v347_v2 = vld [vmem:[%s329_s0] sm:$0x7]  ;;  %352 = vst.msk [vmem:[%s322_s24] sm:$0xff] %vm351_vm1, %v350_v1  ;;  %p688_p8 = scmp.ne.s32.totalorder %s956_s17, %s687_s13  ;;  %s804_s16 = smov [#allocation5]  }
  0x4c   : > { %349 = vst.msk [vmem:[%s343_s7] sm:$0x7] %vm348_vm2, %v347_v2  ;;  %s691_s15 = sshll.u32 %s804_s16, 4  ;;  %s692_s15 = int_to_ptr.vmem [resolvable:$false] %s691_s15 }
  0x4d   : > { %p689_p0 = pnand %p688_p8, %p1066_p11  ;;  %s693_s27 = scalar_lea.vmem %s692_s15, 128 }
  0x4e   : > { %p694_p13 = scmp.lt.s32.totalorder %s956_s17, %s692_s15  ;;  %p695_p3 = scmp.lt.s32.totalorder %s693_s27, %s687_s13 }
  0x4f   : > { %p690_p7 = pneg %p689_p0 }
  0x50   : > { %p696_p6 = por %p695_p3, %p694_p13 }
  0x52   : > { %p697_p4 = pnand %p696_p6, %p690_p7 }
  0x54   : > { %700 = shalt.err (!%p697_p4)
}
  0x55   : > { %s701_s0 = scalar_lea.hbm %s975_s28, 64  ;;  %s705_s26 = scalar_lea.hbm %s1046_s3, 128 }
  0x56   : > { %p702_p10 = scmp.ne.s32.totalorder %s975_s28, %s701_s0  ;;  %p706_p2 = scmp.lt.u32.totalorder %s975_s28, %s1046_s3 }
  0x57   : > { %p707_p5 = scmp.lt.u32.totalorder %s705_s26, %s701_s0  ;;  %p709_p8 = scmp.lt.u32.totalorder %s701_s0, %s975_s28 }
  0x58   : > { %p703_p12 = pnand %p702_p10, %p1066_p11 }
  0x59   : > { %p708_p9 = por %p707_p5, %p706_p2 }
  0x5a   : > { %p704_p1 = pneg %p703_p12 }
  0x5b   : > { %p710_p0 = por %p709_p8, %p708_p9 }
  0x5d   : > { %p711_p7 = pnand %p710_p0, %p704_p1 }
  0x5f   : > { %714 = shalt.err (!%p711_p7)
}
  0x60   : > { %592 = dma.vmem_to_hbm [thread:$0]  (%p1066_p11), %s956_s17, 64, %s975_s28, %s354_s30  }
  0x61   : > { %s587_s9 = sshll.u32 %s793_s21, 7  ;;  %s366_s11 = scalar_lea.sflag [#allocation7], %s947_s25 }
  0x62   : > { %s395_s14 = scalar_lea.hbm %s1048_s5, %s587_s9  ;;  %s715_s13 = scalar_lea.vmem %s960_s10, 128 }
  0x63   : > { %p716_p13 = scmp.ne.s32.totalorder %s960_s10, %s715_s13  ;;  %s805_s16 = smov [#allocation6]  }
  0x64   : > { %s719_s15 = sshll.u32 %s805_s16, 4  ;;  %s720_s15 = int_to_ptr.vmem [resolvable:$false] %s719_s15 }
  0x65   : > { %p717_p3 = pnand %p716_p13, %p1066_p11  ;;  %s721_s27 = scalar_lea.vmem %s720_s15, 256 }
  0x66   : > { %p722_p4 = scmp.lt.s32.totalorder %s960_s10, %s720_s15  ;;  %p723_p10 = scmp.lt.s32.totalorder %s721_s27, %s715_s13 }
  0x67   : > { %p718_p6 = pneg %p717_p3 }
  0x68   : > { %p724_p12 = por %p723_p10, %p722_p4 }
  0x6a   : > { %p725_p1 = pnand %p724_p12, %p718_p6 }
  0x6c   : > { %728 = shalt.err (!%p725_p1)
}
  0x6d   : > { %s729_s21 = scalar_lea.hbm %s395_s14, 128  ;;  %s733_s28 = scalar_lea.hbm %s1048_s5, 256 }
  0x6e   : > { %p730_p2 = scmp.ne.s32.totalorder %s395_s14, %s729_s21  ;;  %p734_p8 = scmp.lt.u32.totalorder %s395_s14, %s1048_s5 }
  0x6f   : > { %p735_p0 = scmp.lt.u32.totalorder %s733_s28, %s729_s21  ;;  %p737_p13 = scmp.lt.u32.totalorder %s729_s21, %s395_s14 }
  0x70   : > { %p731_p5 = pnand %p730_p2, %p1066_p11 }
  0x71   : > { %p736_p7 = por %p735_p0, %p734_p8 }
  0x72   : > { %p732_p9 = pneg %p731_p5 }
  0x73   : > { %p738_p3 = por %p737_p13, %p736_p7 }
  0x75   : > { %p739_p6 = pnand %p738_p3, %p732_p9 }
  0x77   : > { %742 = shalt.err (!%p739_p6)
}
  0x78   : > { %593 = dma.vmem_to_hbm [thread:$0]  (%p1066_p11), %s960_s10, 128, %s395_s14, %s366_s11  }
  0x79 PF: > { %s409_s20 = sand.u32 1, %s781_s18   ;;  %p1067_p4 = scmp.ne.s32.totalorder %s1061_s8, 0 }
  0x7a   : > { %p1068_p10 = scmp.ge.s32.totalorder %s801_s23, 2  ;;  %s410_s22 = scalar_lea.sflag [#allocation4], %s409_s20 }
  0x7c   : > { %p601_p12 = pnand %p1068_p10, %p1067_p4 }
  0x7e   : > { %772 = dma.done.wait (!%p601_p12), %s410_s22, 64  }
  0x7f   : > { %774 = vsyncadd (!%p601_p12), %s410_s22, 4294967232  ;;  %s429_s26 = scalar_lea.sflag [#allocation7], %s409_s20 }
  0x80   : > { %776 = dma.done.wait (!%p601_p12), %s429_s26, 128  }
  0x81   : > { %778 = vsyncadd (!%p601_p12), %s429_s26, 4294967168  ;;  %s25_s23 = sadd.s32 1, %s801_s23   ;;  %s1069_s6 = sld [smem:[#allocation11_spill]] }
  0x82   : > { %p22_p1 = scmp.ge.s32.totalorder %s25_s23, 4   ;;  %s1070_s20 = sld [smem:[#allocation14_spill]] }
  0x83   : > { %s1071_s21 = sld [smem:[#allocation12_spill]]  ;;  %s1072_s22 = sld [smem:[#allocation13_spill]] }
  0x84   : > { %s1073_s18 = smov %s785_s19  ;;  %24 = sbr.rel (!%p22_p1) target bundleno = 10 (0xa), region = 112 }
  0x87   : > { %s1074_s19 = smov %s1069_s6 }
  0x8b   :  { %434 = vsyncpa [#allocation3], 1 }
  0x8c   :  { %436 = vsyncpa [#allocation3 + $0x1], 1 }
  0x8d   :  { %437 = vsyncpa [#allocation4], 1 }
  0x8e   :  { %439 = vsyncpa [#allocation4 + $0x1], 1 }
  0x8f   :  { %440 = vsyncpa [#allocation7], 1 }
  0x90   :  { %442 = vsyncpa [#allocation7 + $0x1], 1 }

</bundles_post_ra>
